<compile_context>
chip_gen: v6e
topology: v6e:2x2x1
jax: 0.10.0
libtpu: 0.0.40
codegen_flags: <defaults>
</compile_context>

<pallas_src>
import jax
import jax.numpy as jnp
from jax.experimental import pallas as pl
from jax.experimental.pallas import tpu as pltpu


def _conv1x1_gelu_kernel(x_ref, w_ref, b_ref, o_ref):
    # x_ref: (Cin, S) ; w_ref: (Cout, Cin) ; b_ref: (Cout, 1) ; o_ref: (Cout, S)
    x = x_ref[...].astype(jnp.float32)
    w = w_ref[...].astype(jnp.float32)
    b = b_ref[...].astype(jnp.float32)

    # 1x1 conv == per-pixel channel contraction; run it on the MXU so the
    # VALU slots only carry the GELU arithmetic.  Bias folds into the epilogue.
    v7 = jnp.dot(w, x, preferred_element_type=jnp.float32) + b

    # tanh-approx GELU, exactly the PyTorch forward's math
    # (v7 + 0.044715*v7^3 factored as v7*(1 + 0.044715*v7^2))
    v7sq = v7 * v7
    inner = v7 * (1.0 + 0.044715 * v7sq) * 0.7978845608028654
    v13 = (0.5 * v7) * (1.0 + jnp.tanh(inner))

    o_ref[...] = v13.astype(o_ref.dtype)


def conv1x1_gelu(x_nchw, weight, bias, *, max_tile_s=16384):
    """x_nchw: (N, C_in, H, W), weight: (C_out, C_in, 1, 1), bias: (C_out,)"""
    N, Cin, H, W = x_nchw.shape
    Cout = weight.shape[0]
    HW = H * W

    # NCHW -> (N, Cin, H*W): pure reshape, no data movement (spatial stays
    # contiguous on the lane axis).
    x3 = x_nchw.reshape(N, Cin, HW)
    w2 = weight.reshape(Cout, Cin)
    b2 = bias.reshape(Cout, 1)

    # Large, lane-aligned spatial tile.  No wrapper-side padding: the grid is
    # sized with cdiv and the partial edge block (if any) is masked by Pallas.
    assert max_tile_s % 128 == 0
    tile_s = min(max_tile_s, pl.cdiv(HW, 128) * 128)
    # Keep >= 2 grid steps when possible so v7x megacore has work to split.
    if N * pl.cdiv(HW, tile_s) < 2 and HW > 128:
        tile_s = pl.cdiv(pl.cdiv(HW, 2), 128) * 128

    grid = (N, pl.cdiv(HW, tile_s))

    out3 = pl.pallas_call(
        _conv1x1_gelu_kernel,
        out_shape=jax.ShapeDtypeStruct((N, Cout, HW), x_nchw.dtype),
        grid=grid,
        in_specs=[
            pl.BlockSpec((None, Cin, tile_s), lambda n, s: (n, 0, s)),
            pl.BlockSpec((Cout, Cin), lambda n, s: (0, 0)),
            pl.BlockSpec((Cout, 1), lambda n, s: (0, 0)),
        ],
        out_specs=pl.BlockSpec((None, Cout, tile_s), lambda n, s: (n, 0, s)),
        compiler_params=pltpu.CompilerParams(
            dimension_semantics=("parallel", "parallel")
        ),
    )(x3, w2, b2)

    # Free reshape back to NCHW.
    return out3.reshape(N, Cout, H, W)


def _reference(x_nchw, weight, bias):
    # pure-JAX reference with the literal PyTorch formula
    Cout, Cin = weight.shape[0], weight.shape[1]
    w2 = weight.reshape(Cout, Cin)
    v7 = jnp.einsum('nchw,oc->nohw', x_nchw, w2) + bias.reshape(1, Cout, 1, 1)
    v8 = v7 * 0.5
    v9 = v7 + v7 * v7 * v7 * 0.044715
    v10 = v9 * 0.7978845608028654
    v13 = v8 * (jnp.tanh(v10) + 1.0)
    return v13


if __name__ == "__main__":
    key = jax.random.PRNGKey(0)
    kx, kw, kb, kx2 = jax.random.split(key, 4)

    # small shapes consistent with Conv2d(8, 8, 1): batch=2, C=8, spatial=16
    N, C, H, W = 2, 8, 16, 16
    x = jax.random.normal(kx, (N, C, H, W), dtype=jnp.float32)

    # deterministic parameter init (PyTorch Conv2d(8, 8, kernel_size=1) style)
    fan_in = C * 1 * 1
    bound = 1.0 / (fan_in ** 0.5)
    weight = jax.random.uniform(kw, (C, C, 1, 1), jnp.float32, -bound, bound)
    bias = jax.random.uniform(kb, (C,), jnp.float32, -bound, bound)

    out = conv1x1_gelu(x, weight, bias)
    out = jax.block_until_ready(out)
    ref = _reference(x, weight, bias)
    assert out.shape == (N, C, H, W)
    assert jnp.allclose(out, ref, atol=1e-5, rtol=1e-5)

    # also exercise the masked partial-edge-block path (HW not a multiple of
    # the 128-lane tile): no wrapper pad/slice is used.
    H2, W2 = 10, 13
    x2 = jax.random.normal(kx2, (N, C, H2, W2), dtype=jnp.float32)
    out2 = conv1x1_gelu(x2, weight, bias)
    out2 = jax.block_until_ready(out2)
    ref2 = _reference(x2, weight, bias)
    assert out2.shape == (N, C, H2, W2)
    assert jnp.allclose(out2, ref2, atol=1e-5, rtol=1e-5)

    print("KERNEL_OK")
</pallas_src>

<mosaic_0001>
module attributes {stable_mosaic.version = 11 : i64} {
  func.func @_conv1x1_gelu_kernel(%arg0: i32, %arg1: i32, %arg2: memref<1x8x256xf32, #tpu.memory_space<vmem>>, %arg3: memref<8x8xf32, #tpu.memory_space<vmem>>, %arg4: memref<8x1xf32, #tpu.memory_space<vmem>>, %arg5: memref<1x8x256xf32, #tpu.memory_space<vmem>>) attributes {dimension_semantics = [#tpu.dimension_semantics<parallel>, #tpu.dimension_semantics<parallel>], iteration_bounds = array<i64: 2, 1>, scalar_prefetch = 0 : i64, scratch_operands = 0 : i64, tpu.core_type = #tpu.core_type<tc>, window_params = [{transform_indices = @transform_0, window_bounds = array<i64: 1, 8, 256>}, {pipeline_mode = #tpu.pipeline_mode<synchronous>, transform_indices = @transform_1, window_bounds = array<i64: 8, 8>}, {pipeline_mode = #tpu.pipeline_mode<synchronous>, transform_indices = @transform_2, window_bounds = array<i64: 8, 1>}, {transform_indices = @transform_3, window_bounds = array<i64: 1, 8, 256>}]} {
    %c0 = arith.constant 0 : index
    %c0_0 = arith.constant 0 : index
    %c0_1 = arith.constant 0 : index
    %0 = vector.load %arg2[%c0, %c0_0, %c0_1] : memref<1x8x256xf32, #tpu.memory_space<vmem>>, vector<1x8x256xf32>
    %1 = vector.shape_cast %0 : vector<1x8x256xf32> to vector<8x256xf32>
    %c0_2 = arith.constant 0 : index
    %c0_3 = arith.constant 0 : index
    %2 = vector.load %arg3[%c0_2, %c0_3] : memref<8x8xf32, #tpu.memory_space<vmem>>, vector<8x8xf32>
    %c0_4 = arith.constant 0 : index
    %c0_5 = arith.constant 0 : index
    %3 = vector.load %arg4[%c0_4, %c0_5] : memref<8x1xf32, #tpu.memory_space<vmem>>, vector<8x1xf32>
    %cst = arith.constant dense<0.000000e+00> : vector<8x256xf32>
    %4 = tpu.matmul %2, %1, %cst {dimension_numbers = #tpu.dot_dimension_numbers<[1], [0], [0], [1], [0, 0, 1, 1], [], []>} : vector<8x8xf32>, vector<8x256xf32>, vector<8x256xf32> -> vector<8x256xf32>
    %5 = vector.broadcast %3 : vector<8x1xf32> to vector<8x256xf32>
    %6 = arith.addf %4, %5 : vector<8x256xf32>
    %7 = arith.mulf %6, %6 : vector<8x256xf32>
    %cst_6 = arith.constant 4.471500e-02 : f32
    %8 = vector.broadcast %cst_6 : f32 to vector<8x256xf32>
    %9 = arith.mulf %8, %7 : vector<8x256xf32>
    %cst_7 = arith.constant 1.000000e+00 : f32
    %10 = vector.broadcast %cst_7 : f32 to vector<8x256xf32>
    %11 = arith.addf %10, %9 : vector<8x256xf32>
    %12 = arith.mulf %6, %11 : vector<8x256xf32>
    %cst_8 = arith.constant 0.797884583 : f32
    %13 = vector.broadcast %cst_8 : f32 to vector<8x256xf32>
    %14 = arith.mulf %12, %13 : vector<8x256xf32>
    %cst_9 = arith.constant 5.000000e-01 : f32
    %15 = vector.broadcast %cst_9 : f32 to vector<8x256xf32>
    %16 = arith.mulf %15, %6 : vector<8x256xf32>
    %17 = math.tanh %14 : vector<8x256xf32>
    %cst_10 = arith.constant 1.000000e+00 : f32
    %18 = vector.broadcast %cst_10 : f32 to vector<8x256xf32>
    %19 = arith.addf %18, %17 : vector<8x256xf32>
    %20 = arith.mulf %16, %19 : vector<8x256xf32>
    %c0_11 = arith.constant 0 : index
    %c0_12 = arith.constant 0 : index
    %c0_13 = arith.constant 0 : index
    %21 = vector.load %arg5[%c0_11, %c0_12, %c0_13] : memref<1x8x256xf32, #tpu.memory_space<vmem>>, vector<1x8x256xf32>
    %22 = vector.shape_cast %21 : vector<1x8x256xf32> to vector<8x256xf32>
    %23 = vector.shape_cast %20 : vector<8x256xf32> to vector<1x8x256xf32>
    tpu.vector_store %arg5[%c0_11, %c0_12, %c0_13], %23 {strides = array<i32>} : memref<1x8x256xf32, #tpu.memory_space<vmem>>, vector<1x8x256xf32>,
    return
  }
  func.func @transform_0(%arg0: i32, %arg1: i32) -> (i32, i32, i32) {
    %c0_i32 = arith.constant 0 : i32
    %c0_i32_0 = arith.constant 0 : i32
    return %arg0, %c0_i32, %arg1 : i32, i32, i32
  }
  func.func @transform_1(%arg0: i32, %arg1: i32) -> (i32, i32) {
    %c0_i32 = arith.constant 0 : i32
    %c0_i32_0 = arith.constant 0 : i32
    %c0_i32_1 = arith.constant 0 : i32
    return %c0_i32, %c0_i32_0 : i32, i32
  }
  func.func @transform_2(%arg0: i32, %arg1: i32) -> (i32, i32) {
    %c0_i32 = arith.constant 0 : i32
    %c0_i32_0 = arith.constant 0 : i32
    %c0_i32_1 = arith.constant 0 : i32
    return %c0_i32, %c0_i32_0 : i32, i32
  }
  func.func @transform_3(%arg0: i32, %arg1: i32) -> (i32, i32, i32) {
    %c0_i32 = arith.constant 0 : i32
    %c0_i32_0 = arith.constant 0 : i32
    return %arg0, %c0_i32, %arg1 : i32, i32, i32
  }
}

</mosaic_0001>

<bundles_post_ra>
// kernel: tpu_custom_call.1
= control target key start
LH: loop header
LB: loop body
LE: loop exit
PB: predicated region body
PF: predicated region fallthrough
CT: control target
= control target key end

     0   :  { %8 = vsyncpa [#allocation3], 0  ;;  %s777_s0 = inlined_call_operand.hbm [shape: f32[2,8,256], index: 0, kind: input, shape index: {}]   ;;  %s778_s1 = inlined_call_operand.vmem [shape: f32[8,8], index: 1, kind: input, shape index: {}]   ;;  %s779_s2 = inlined_call_operand.vmem [shape: f32[8,1], index: 2, kind: input, shape index: {}]   ;;  %s780_s3 = inlined_call_operand.hbm [shape: f32[2,8,256], index: 3, kind: output, shape index: {}]  }
   0x1   :  { %10 = vsyncpa [#allocation3 + $0x1], 0 }
   0x2   :  { %11 = vsyncpa [#allocation4], 0 }
   0x3   :  { %13 = vsyncpa [#allocation4 + $0x1], 0  ;;  %s633_s12 = smov 0   ;;  %s635_s13 = smov 0  }
   0x4   :  { %s637_s14 = smov 0   ;;  %s639_s15 = smov 0  }
   0x5   :  { %s641_s16 = smov 0   ;;  %s643_s17 = smov 0  }
   0x6 LB: > { %s412_s18 = sadd.s32 4294967295, %s607_s17   ;;  %s413_s19 = sadd.s32 4294967294, %s607_s17   ;;  %s607_s17 = sphi %s643_s17, %s19_s17   ;;  %s603_s16 = sphi %s641_s16, %s792_s16   ;;  %s599_s15 = sphi %s639_s15, %s791_s15   ;;  %s595_s14 = sphi %s637_s14, %s790_s14   ;;  %s591_s13 = sphi %s635_s13, %s789_s13   ;;  %s587_s12 = sphi %s633_s12, %s788_s12  }
   0x7   : > { %s31_s20 = sadd.s32 1, %s603_s16  ;;  %s40_s21 = sadd.s32 1, %s595_s14 }
   0x8   : > { %p33_p0 = scmp.ge.s32.totalorder %s31_s20, 2  ;;  %p47_p1 = scmp.ne.s32.totalorder %s595_s14, %s591_s13 }
   0x9   : > { %p48_p2 = scmp.eq.s32.totalorder %s607_s17, 0  ;;  %p53_p3 = scmp.ne.s32.totalorder %s591_s13, %s587_s12 }
   0xa   : > { %s794_s20 = smov (%p33_p0, %s31_s20), 0  ;;  %p54_p5 = scmp.eq.s32.totalorder %s412_s18, 0 }
   0xb   : > { %p674_p4 = por %p48_p2, %p47_p1  ;;  %s35_s23 = ssub.s32 %s603_s16, %s794_s20 }
   0xc   : > { %p121_p6 = scmp.eq.s32.totalorder %s412_s18, 1  ;;  %p38_p7 = scmp.eq.s32.totalorder %s35_s23, 0 }
   0xd   : > { %p680_p8 = por %p54_p5, %p53_p3  ;;  %p127_p10 = scmp.eq.s32.totalorder %s413_s19, 1 }
   0xe   : > { %p684_p9 = por %p121_p6, %p47_p1  ;;  %p442_p13 = scmp.lt.s32.totalorder %s607_s17, 2 }
   0xf   : > { %s689_s26 = scalar_select %p38_p7, %s595_s14, %s40_s21  }
  0x10   : > { %p691_p11 = por %p127_p10, %p53_p3  ;;  %s153_s28 = sand.u32 1, %s595_s14  }
  0x11   : > { %s416_s29 = sshll.u32 %s153_s28, 4  ;;  %s428_s30 = sshll.u32 %s603_s16, 8 }
  0x12   : > { %s784_s27 = scalar_select %p691_p11, 1, 0 }
  0x13   : > { %s165_s6 = scalar_lea.hbm %s777_s0, %s428_s30  ;;  %s157_s7 = scalar_lea.vmem [#allocation2], %s416_s29 }
  0x14   : > { %s167_s8 = sshll.u32 %s157_s7, 4  ;;  %p704_p0 = pnand %p442_p13, %p674_p4  ;;  %s168_s8 = int_to_ptr.vmem [resolvable:$true] %s167_s8 }
  0x15   : > { %p419_p1 = scmp.ge.s32.totalorder %s607_s17, 1  ;;  %p172_p2 = scmp.lt.s32.totalorder %s607_s17, 3 }
  0x16   : > { %s154_s10 = scalar_lea.sflag [#allocation3], %s153_s28  ;;  %p501_p3 = pneg %p704_p0 }
  0x17   : > { %s512_s11 = scalar_lea.vmem %s168_s8, 256  ;;  %s609_s18 = smov [#allocation2]  }
  0x18   : > { %p513_p5 = scmp.ne.s32.totalorder %s168_s8, %s512_s11  ;;  %s517_s19 = sshll.u32 %s609_s18, 4  ;;  %s518_s19 = int_to_ptr.vmem [resolvable:$false] %s517_s19 }
  0x19   : > { %s519_s21 = scalar_lea.vmem %s518_s19, 512  ;;  %p520_p10 = scmp.lt.s32.totalorder %s168_s8, %s518_s19 }
  0x1a   : > { %p515_p6 = pnand %p513_p5, %p501_p3  ;;  %p521_p12 = scmp.lt.s32.totalorder %s519_s21, %s512_s11 }
  0x1c   : > { %p516_p7 = pneg %p515_p6  ;;  %p522_p4 = por %p521_p12, %p520_p10 }
  0x1e   : > { %p523_p13 = pnand %p522_p4, %p516_p7 }
  0x20   : > { %526 = shalt.err (!%p523_p13)
}
  0x21   : > { %437 = dma.hbm_to_vmem [thread:$0]  (!%p704_p0), %s165_s6, 256, %s168_s8, %s154_s10  }
  0x22   : > { %p173_p11 = pnand %p419_p1, %p172_p2 }
  0x23   : > { %s719_s22 = sand.u32 (!%p173_p11), 1, %s591_s13  }
  0x24   : > { %176 = sbr.rel (%p173_p11) target bundleno = 284 (0x11c), region = 32  ;;  %s420_s23 = sshll.u32 (!%p173_p11), %s719_s22, 4 }
  0x25   : > { %s179_s28 = scalar_lea.sflag (!%p173_p11), [#allocation3], %s719_s22  ;;  %s182_s29 = scalar_lea.vmem (!%p173_p11), [#allocation2], %s420_s23 }
  0x29   : > { %578 = dma.done.wait (%p680_p8), %s179_s28, 256  }
  0x2a   : > { %580 = vsyncadd (%p680_p8), %s179_s28, 4294967040  ;;  %v610_v0 = vmov 0.0   ;;  %v611_v1 = vmov 0   ;;  %v208_v2 = vld [vmem:[%s182_s29 + $0x8] sm:$0xff]  ;;  %v207_v3 = vld [vmem:[%s182_s29] sm:$0xff]  ;;  %vm216_vm0 = vcmask 64512  }
  0x2b   : > { %284 = vmatprep.mubr.f32.mxu0 %v610_v0  ;;  %494 = vset.pattern.permute.xlu0 %v611_v1  ;;  %v209_v4 = vld [vmem:[%s778_s1] sm:$0xff]  ;;  %s429_s24 = sshll.u32 %s599_s15, 8  ;;  %s204_s7 = scalar_lea.vmem [#allocation5], %s420_s23 }
  0x2c   : > { %250 = vmatprep.subr.mxu0 %v208_v2  ;;  %v210_v5 = vld [vmem:[%s779_s2] sm:$0xff]  ;;  %s328_s8 = sshll.u32 %s204_s7, 4  ;;  %s326_s11 = scalar_lea.hbm %s780_s3, %s429_s24  ;;  %s329_s8 = int_to_ptr.vmem [resolvable:$true] %s328_s8 }
  0x2d   : > { %251 = vmatpush1.msra.mxu0 %v207_v3  ;;  %213 = vperm.xlu0 %494, %v210_v5   ;;  %s312_s18 = scalar_lea.sflag [#allocation4], %s719_s22  ;;  %s527_s19 = scalar_lea.vmem %s329_s8, 256 }
  0x2e   : > { %422 = vmatmul.mubr.msk.f32.vlgmr.msra.gmra.mxu0 %vm216_vm0, %v209_v4  ;;  %p528_p8 = scmp.ne.s32.totalorder %s329_s8, %s527_s19  ;;  %s612_s15 = smov [#allocation5]  }
  0x2f   : > { %s531_s21 = sshll.u32 %s612_s15, 4  ;;  %s532_s21 = int_to_ptr.vmem [resolvable:$false] %s531_s21 }
  0x30   : > { %p529_p11 = pnand %p528_p8, %p684_p9  ;;  %s533_s23 = scalar_lea.vmem %s532_s21, 512 }
  0x31   : > { %p534_p0 = scmp.lt.s32.totalorder %s329_s8, %s532_s21  ;;  %p535_p1 = scmp.lt.s32.totalorder %s533_s23, %s527_s19 }
  0x32   : > { %p530_p12 = pneg %p529_p11 }
  0x33   : > { %p536_p2 = por %p535_p1, %p534_p0 }
  0x35   : > { %p537_p3 = pnand %p536_p2, %p530_p12 }
  0xa8   : > { %v214_v6 = vpop.permute.xlu0 %213 }
  0xee   : > { %v286_v7 = vpop.f32.mrf.mxu0 }
  0xef   : > { %v287_v8 = vadd.f32 %v286_v7, %v214_v6 }
  0xf0   : > { %v288_v9 = vpop.f32.mrf.mxu0 }
  0xf1   : > { %v291_v10 = vmul.f32 %v287_v8, %v287_v8  ;;  %v289_v11 = vadd.f32 %v288_v9, %v214_v6  ;;  %v301_v22 = vmul.f32 0.5, %v287_v8 }
  0xf3   : > { %v293_v12 = vmul.f32 0.044715, %v291_v10  ;;  %v292_v13 = vmul.f32 %v289_v11, %v289_v11  ;;  %v302_v26 = vmul.f32 0.5, %v289_v11 }
  0xf5   : > { %v295_v14 = vadd.f32 1.0, %v293_v12  ;;  %v294_v15 = vmul.f32 0.044715, %v292_v13 }
  0xf7   : > { %v297_v16 = vmul.f32 %v295_v14, %v287_v8  ;;  %v296_v17 = vadd.f32 1.0, %v294_v15 }
  0xf9   : > { %v299_v18 = vmul.f32 0.7978846, %v297_v16  ;;  %v298_v19 = vmul.f32 %v296_v17, %v289_v11 }
  0xfb   : > { %495 = vtanh.f32 %v299_v18  ;;  %v300_v20 = vmul.f32 0.7978846, %v298_v19 }
  0xfd   : > { %497 = vtanh.f32 %v300_v20 }
 0x108   : > { %v496_v21 = vpop.eup %495 }
 0x109   : > { %v305_v23 = vadd.f32 1.0, %v496_v21 }
 0x10a   : > { %v498_v24 = vpop.eup %497 }
 0x10b   : > { %v307_v25 = vmul.f32 %v305_v23, %v301_v22  ;;  %v306_v27 = vadd.f32 1.0, %v498_v24 }
 0x10d   : > { %v308_v28 = vmul.f32 %v306_v27, %v302_v26  ;;  %309 = vst [vmem:[%s204_s7] sm:$0xff] %v307_v25 }
 0x10f   : > { %310 = vst [vmem:[%s204_s7 + $0x8] sm:$0xff] %v308_v28 }
 0x110   : > { %540 = shalt.err (!%p537_p3)
}
 0x111   : > { %s541_s28 = scalar_lea.hbm %s326_s11, 256  ;;  %s545_s30 = scalar_lea.hbm %s780_s3, 512 }
 0x112   : > { %p542_p5 = scmp.ne.s32.totalorder %s326_s11, %s541_s28  ;;  %p546_p10 = scmp.lt.s32.totalorder %s326_s11, %s780_s3 }
 0x113   : > { %p547_p4 = scmp.lt.s32.totalorder %s545_s30, %s541_s28 }
 0x114   : > { %p543_p6 = pnand %p542_p5, %p684_p9 }
 0x115   : > { %p548_p13 = por %p547_p4, %p546_p10 }
 0x116   : > { %p544_p7 = pneg %p543_p6 }
 0x118   : > { %p549_p8 = pnand %p548_p13, %p544_p7 }
 0x11a   : > { %552 = shalt.err (!%p549_p8)
}
 0x11b   : > { %432 = dma.vmem_to_hbm [thread:$0]  (%p684_p9), %s329_s8, 256, %s326_s11, %s312_s18  }
 0x11c PF: > { %s340_s6 = sand.u32 1, %s587_s12   ;;  %p786_p11 = scmp.ne.s32.totalorder %s784_s27, 0 }
 0x11d   : > { %p787_p12 = scmp.ge.s32.totalorder %s607_s17, 2  ;;  %s341_s24 = scalar_lea.sflag [#allocation4], %s340_s6 }
 0x11f   : > { %p439_p0 = pnand %p787_p12, %p786_p11 }
 0x121   : > { %p440_p1 = pneg %p439_p0 }
 0x123   : > { %582 = dma.done.wait (%p440_p1), %s341_s24, 256  }
 0x124   : > { %584 = vsyncadd (%p440_p1), %s341_s24, 4294967040  ;;  %s19_s17 = sadd.s32 1, %s607_s17   ;;  %s788_s12 = smov %s591_s13 }
 0x125   : > { %p16_p2 = scmp.ge.s32.totalorder %s19_s17, 4   ;;  %s789_s13 = smov %s595_s14 }
 0x126   : > { %s790_s14 = smov %s689_s26  ;;  %s791_s15 = smov %s603_s16 }
 0x127   : > { %s792_s16 = smov %s794_s20  ;;  %18 = sbr.rel (!%p16_p2) target bundleno = 6 (0x6), region = 77 }
 0x12c   :  { %346 = vsyncpa [#allocation3], 1 }
 0x12d   :  { %348 = vsyncpa [#allocation3 + $0x1], 1 }
 0x12e   :  { %349 = vsyncpa [#allocation4], 1 }
 0x12f   :  { %351 = vsyncpa [#allocation4 + $0x1], 1 }

</bundles_post_ra>
